<compile_context>
chip_gen: v7x
topology: tpu7x:2x2x1
jax: 0.10.0
libtpu: 0.0.40
codegen_flags: <defaults>
</compile_context>

<pallas_src>
import jax
import jax.numpy as jnp
from jax.experimental import pallas as pl
from jax.experimental.pallas import tpu as pltpu

_MiB = 1024 * 1024


def _round_up(x, m):
    return ((x + m - 1) // m) * m


def _sublane(dtype):
    # Sublane packing rows: 8 for 32-bit, 16 for 16-bit, 32 for 8-bit dtypes.
    return max(8, 32 // jnp.dtype(dtype).itemsize)


def _tpu_generation_params():
    """Returns (physical VMEM bytes per TensorCore, TensorCores per chip)."""
    try:
        kind = jax.devices()[0].device_kind.lower()
    except Exception:
        kind = ""
    if "v7" in kind or "7x" in kind:
        return 64 * _MiB, 2          # v7x: 64 MiB VMEM / TC, 2 TCs share ~3.2 TB/s HBM
    if "v5" in kind or "v6" in kind:
        return 128 * _MiB, 1         # v5e / v6e: 128 MiB VMEM, single TC
    # Unknown generation: assume the tightest constraints (v7x-like) -> safe everywhere.
    return 64 * _MiB, 2


def _choose_spatial_tile(S, cin, cout, dtype, budget_bytes, min_total_blocks, N):
    """Pick a lane-dense spatial tile that fits the double-buffered VMEM budget.

    Per-voxel cost counts sublane padding of both the (Cin, ts) input block and the
    (Cout, ts) output block, times 2 for double buffering (the review's corrected
    footprint).  When one block covers the whole extent, return S directly so there
    is no ragged tail / masked-store path.
    """
    if S <= 128:
        return S
    itemsize = jnp.dtype(dtype).itemsize
    sub = _sublane(dtype)
    per_voxel = (_round_up(cin, sub) + _round_up(cout, sub)) * itemsize * 2
    max_ts = max(128, budget_bytes // per_voxel)

    # On multi-TC chips require enough total blocks for the grid to shard across cores.
    min_spatial_blocks = max(1, -(-min_total_blocks // N))      # ceil(min_total / N)
    nb = max(pl.cdiv(S, max_ts), min_spatial_blocks)
    if nb == 1:
        return S                                                # whole extent, no tail
    # Balanced, lane-dense (multiple-of-128) tile; only the last block may be ragged.
    return min(_round_up(pl.cdiv(S, nb), 128), _round_up(S, 128))


def _vmem_limit_bytes(ts, cin, cout, x_dtype, w_dtype, phys_vmem):
    """Scoped-VMEM limit derived from the actual padded, double-buffered block sizes."""
    x_item = jnp.dtype(x_dtype).itemsize
    w_item = jnp.dtype(w_dtype).itemsize
    ts_pad = _round_up(ts, 128)
    act_block = _round_up(cin, _sublane(x_dtype)) * ts_pad * x_item
    out_block = _round_up(cout, _sublane(x_dtype)) * ts_pad * x_item
    w_block = _round_up(cout, _sublane(w_dtype)) * _round_up(cin, 128) * w_item
    need = 2 * (act_block + out_block + w_block)                # double-buffered operands
    limit = max(need + 8 * _MiB, 32 * _MiB)                     # compiler-scratch margin
    return min(limit, phys_vmem - 8 * _MiB)                     # headroom under physical VMEM


def _pointwise_conv_kernel(x_ref, w_ref, o_ref):
    # x_ref: (Cin, ts)   w_ref: (Cout, Cin)   o_ref: (Cout, ts)
    # Channel contraction with spatial on lanes -> lane-dense loads and stores.
    o_ref[...] = jnp.dot(
        w_ref[...], x_ref[...], preferred_element_type=jnp.float32
    ).astype(o_ref.dtype)


def one_conv_1x1x1(x_ncdhw, weight_oi, *, vmem_block_budget_bytes=None):
    """1x1x1 Conv3d (pointwise channel mixing), no bias.

    x_ncdhw  : (N, C_in, D, H, W)
    weight_oi: (C_out, C_in)   (PyTorch Conv3d weight with 1x1x1 kernel dims squeezed)
    returns  : (N, C_out, D, H, W)
    """
    N, Cin, D, H, W = x_ncdhw.shape
    Cout = weight_oi.shape[0]
    S = D * H * W

    # Free, contiguous reshape (no HBM transpose).
    x3 = x_ncdhw.reshape(N, Cin, S)

    phys_vmem, num_tc = _tpu_generation_params()
    if vmem_block_budget_bytes is None:
        # Budget for the double-buffered in+out pipeline blocks:
        # ~48 MiB on v5e/v6e (128 MiB VMEM), ~24 MiB on v7x (64 MiB VMEM).
        vmem_block_budget_bytes = min(phys_vmem // 2 - 8 * _MiB, 48 * _MiB)

    # On v7x expose >= 2 blocks per TC so both cores share the HBM stream.
    min_total_blocks = 2 * num_tc if num_tc > 1 else 1
    ts = _choose_spatial_tile(
        S, Cin, Cout, x_ncdhw.dtype, vmem_block_budget_bytes, min_total_blocks, N
    )
    grid = (N, pl.cdiv(S, ts))

    vmem_limit = _vmem_limit_bytes(
        ts, Cin, Cout, x_ncdhw.dtype, weight_oi.dtype, phys_vmem
    )

    # Advisory cost estimate: pure HBM streaming.
    itemsize = jnp.dtype(x_ncdhw.dtype).itemsize
    flops = 2 * N * S * Cin * Cout
    bytes_accessed = (
        (N * Cin * S + N * Cout * S) * itemsize
        + weight_oi.size * jnp.dtype(weight_oi.dtype).itemsize
    )

    out3 = pl.pallas_call(
        _pointwise_conv_kernel,
        out_shape=jax.ShapeDtypeStruct((N, Cout, S), x_ncdhw.dtype),
        grid_spec=pltpu.PrefetchScalarGridSpec(
            num_scalar_prefetch=0,
            grid=grid,
            in_specs=[
                # Activation: large lane-dense spatial tiles, double-buffered.
                # (pl.Buffered(3) is an optional sweep if profiling shows exposed DMA.)
                pl.BlockSpec((pl.Squeezed(), Cin, ts), lambda n, s: (n, 0, s)),
                # Weight: tiny (Cout, Cin), constant index map -> resident, no re-DMA.
                pl.BlockSpec((Cout, Cin), lambda n, s: (0, 0)),
            ],
            out_specs=pl.BlockSpec((pl.Squeezed(), Cout, ts), lambda n, s: (n, 0, s)),
        ),
        compiler_params=pltpu.CompilerParams(
            # Both axes independent: megacore sharding on v7x, no-op on v5e/v6e.
            dimension_semantics=("parallel", "parallel"),
            vmem_limit_bytes=vmem_limit,
        ),
        cost_estimate=pl.CostEstimate(
            flops=flops, transcendentals=0, bytes_accessed=bytes_accessed
        ),
    )(x3, weight_oi)

    # Free, contiguous reshape back to NCDHW.
    return out3.reshape(N, Cout, D, H, W)


def reference_conv(x_ncdhw, weight_oi):
    # Pure-JAX reference (einsum over channels) for verification.
    return jnp.einsum("ncdhw,oc->nodhw", x_ncdhw, weight_oi)


if __name__ == "__main__":
    key = jax.random.PRNGKey(0)
    kx, kw = jax.random.split(key)

    # Small shapes consistent with the module: N=2, C_in=4, C_out=8, D=H=W=8.
    N, Cin, Cout, D, H, W = 2, 4, 8, 8, 8, 8

    x = jax.random.normal(kx, (N, Cin, D, H, W), dtype=jnp.float32)

    # Conv3d weight with kernel_size=1 -> (C_out, C_in, 1, 1, 1); squeezed to (C_out, C_in).
    fan_in = Cin * 1 * 1 * 1
    bound = 1.0 / (fan_in ** 0.5)
    weight = jax.random.uniform(
        kw, (Cout, Cin), dtype=jnp.float32, minval=-bound, maxval=bound
    )

    out = one_conv_1x1x1(x, weight)
    out = jax.block_until_ready(out)

    ref = reference_conv(x, weight)
    assert out.shape == (N, Cout, D, H, W)
    assert jnp.allclose(out, ref, atol=1e-5, rtol=1e-5)

    print("KERNEL_OK")
</pallas_src>

<mosaic_0001>
module attributes {stable_mosaic.version = 11 : i64} {
  func.func @_pointwise_conv_kernel(%arg0: i32, %arg1: i32, %arg2: memref<1x4x256xf32, #tpu.memory_space<vmem>>, %arg3: memref<8x4xf32, #tpu.memory_space<vmem>>, %arg4: memref<1x8x256xf32, #tpu.memory_space<vmem>>) attributes {dimension_semantics = [#tpu.dimension_semantics<parallel>, #tpu.dimension_semantics<parallel>], iteration_bounds = array<i64: 2, 2>, scalar_prefetch = 0 : i64, scratch_operands = 0 : i64, tpu.core_type = #tpu.core_type<tc>, window_params = [{transform_indices = @transform_0, window_bounds = array<i64: 1, 4, 256>}, {pipeline_mode = #tpu.pipeline_mode<synchronous>, transform_indices = @transform_1, window_bounds = array<i64: 8, 4>}, {transform_indices = @transform_2, window_bounds = array<i64: 1, 8, 256>}]} {
    %c0 = arith.constant 0 : index
    %c0_0 = arith.constant 0 : index
    %0 = vector.load %arg3[%c0, %c0_0] : memref<8x4xf32, #tpu.memory_space<vmem>>, vector<8x4xf32>
    %c0_1 = arith.constant 0 : index
    %c0_2 = arith.constant 0 : index
    %c0_3 = arith.constant 0 : index
    %1 = vector.load %arg2[%c0_1, %c0_2, %c0_3] : memref<1x4x256xf32, #tpu.memory_space<vmem>>, vector<1x4x256xf32>
    %2 = vector.shape_cast %1 : vector<1x4x256xf32> to vector<4x256xf32>
    %cst = arith.constant dense<0.000000e+00> : vector<8x256xf32>
    %3 = tpu.matmul %0, %2, %cst {dimension_numbers = #tpu.dot_dimension_numbers<[1], [0], [0], [1], [0, 0, 1, 1], [], []>} : vector<8x4xf32>, vector<4x256xf32>, vector<8x256xf32> -> vector<8x256xf32>
    %c0_4 = arith.constant 0 : index
    %c0_5 = arith.constant 0 : index
    %c0_6 = arith.constant 0 : index
    %4 = vector.load %arg4[%c0_4, %c0_5, %c0_6] : memref<1x8x256xf32, #tpu.memory_space<vmem>>, vector<1x8x256xf32>
    %5 = vector.shape_cast %4 : vector<1x8x256xf32> to vector<8x256xf32>
    %6 = vector.shape_cast %3 : vector<8x256xf32> to vector<1x8x256xf32>
    tpu.vector_store %arg4[%c0_4, %c0_5, %c0_6], %6 {strides = array<i32>} : memref<1x8x256xf32, #tpu.memory_space<vmem>>, vector<1x8x256xf32>,
    return
  }
  func.func @transform_0(%arg0: i32, %arg1: i32) -> (i32, i32, i32) {
    %c0_i32 = arith.constant 0 : i32
    %c0_i32_0 = arith.constant 0 : i32
    return %arg0, %c0_i32, %arg1 : i32, i32, i32
  }
  func.func @transform_1(%arg0: i32, %arg1: i32) -> (i32, i32) {
    %c0_i32 = arith.constant 0 : i32
    %c0_i32_0 = arith.constant 0 : i32
    %c0_i32_1 = arith.constant 0 : i32
    return %c0_i32, %c0_i32_0 : i32, i32
  }
  func.func @transform_2(%arg0: i32, %arg1: i32) -> (i32, i32, i32) {
    %c0_i32 = arith.constant 0 : i32
    %c0_i32_0 = arith.constant 0 : i32
    return %arg0, %c0_i32, %arg1 : i32, i32, i32
  }
}

</mosaic_0001>

<bundles_post_ra>
// kernel: tpu_custom_call.1
= control target key start
LH: loop header
LB: loop body
LE: loop exit
PB: predicated region body
PF: predicated region fallthrough
CT: control target
= control target key end

     0   :  { %7 = vsyncpa [#allocation3], 0  ;;  %s816_s0 = inlined_call_operand.hbm [shape: f32[2,4,512], index: 0, kind: input, shape index: {}]   ;;  %s817_s1 = inlined_call_operand.vmem [shape: f32[8,4], index: 1, kind: input, shape index: {}]   ;;  %s818_s2 = inlined_call_operand.hbm [shape: f32[2,8,512], index: 2, kind: output, shape index: {}]  }
   0x1   :  { %9 = vsyncpa [#allocation3 + $0x1], 0 }
   0x2   :  { %10 = vsyncpa [#allocation4], 0 }
   0x3   :  { %12 = vsyncpa [#allocation4 + $0x1], 0  ;;  %s618_s9 = smov 0   ;;  %s620_s10 = smov 0  }
   0x4   :  { %s622_s11 = smov 0   ;;  %s624_s12 = smov 0  }
   0x5   :  { %s626_s13 = smov 0   ;;  %s628_s14 = smov 0  }
   0x6   :  { %s630_s15 = smov 0   ;;  %s632_s16 = smov 0  }
   0x7 LB: > { %s370_s17 = sadd.s32 4294967295, %s598_s16   ;;  %s371_s18 = sadd.s32 4294967294, %s598_s16   ;;  %s598_s16 = sphi %s632_s16, %s18_s16   ;;  %s594_s15 = sphi %s630_s15, %s835_s15   ;;  %s590_s14 = sphi %s628_s14, %s834_s14   ;;  %s586_s13 = sphi %s626_s13, %s833_s13   ;;  %s582_s12 = sphi %s624_s12, %s832_s12   ;;  %s578_s11 = sphi %s622_s11, %s831_s11   ;;  %s574_s10 = sphi %s620_s10, %s830_s10   ;;  %s570_s9 = sphi %s618_s9, %s829_s9  }
   0x8   : > { %s27_s19 = sadd.s32 1, %s590_s14  ;;  %s30_s20 = sadd.s32 1, %s594_s15 }
   0x9   : > { %p28_p0 = scmp.ge.s32.totalorder %s27_s19, 2  ;;  %s39_s21 = sadd.s32 1, %s578_s11 }
   0xa   : > { %p46_p1 = scmp.ne.s32.totalorder %s578_s11, %s574_s10  ;;  %p47_p2 = scmp.eq.s32.totalorder %s598_s16, 0 }
   0xb   : > { %s837_s19 = smov (%p28_p0, %s27_s19), 0  ;;  %s839_s20 = smov (!%p28_p0, %s30_s20), %s594_s15 }
   0xc   : > { %s35_s22 = ssub.s32 %s590_s14, %s837_s19  ;;  %p671_p3 = por %p47_p2, %p46_p1 }
   0xd   : > { %p32_p4 = scmp.ge.s32.totalorder %s839_s20, 2  ;;  %p52_p5 = scmp.ne.s32.totalorder %s574_s10, %s570_s9 }
   0xe   : > { %p53_p6 = scmp.eq.s32.totalorder %s370_s17, 0  ;;  %p99_p7 = scmp.eq.s32.totalorder %s370_s17, 3 }
   0xf   : > { %s841_s20 = smov (%p32_p4, %s839_s20), 0  ;;  %p105_p10 = scmp.eq.s32.totalorder %s371_s18, 3 }
  0x10   : > { %p679_p8 = por %p53_p6, %p52_p5  ;;  %p683_p9 = por %p99_p7, %p46_p1 }
  0x11   : > { %s34_s26 = ssub.s32 %s594_s15, %s841_s20  ;;  %p689_p12 = por %p105_p10, %p52_p5 }
  0x12   : > { %s822_s25 = scalar_select %p683_p9, 1, 0 }
  0x13   : > { %s36_s27 = sor.u32 %s35_s22, %s34_s26  ;;  %p402_p13 = scmp.lt.s32.totalorder %s598_s16, 4 }
  0x14   : > { %p37_p11 = scmp.eq.s32.totalorder %s36_s27, 0  ;;  %s128_s29 = sand.u32 1, %s578_s11  }
  0x15   : > { %s823_s28 = scalar_select %p689_p12, 1, 0 }
  0x16   : > { %s696_s30 = scalar_select %p37_p11, %s578_s11, %s39_s21  }
  0x17   : > { %s374_s3 = sshll.u32 %s128_s29, 3  ;;  %s375_s4 = sshll.u32 %s590_s14, 1 }
  0x18   : > { %s376_s5 = sshll.u32 %s594_s15, 2  ;;  %s132_s6 = scalar_lea.vmem [#allocation2], %s374_s3 }
  0x19   : > { %s142_s7 = sshll.u32 %s132_s6, 4  ;;  %s138_s8 = sadd.s32 %s376_s5, %s375_s4  ;;  %s700_s7 = int_to_ptr.vmem [resolvable:$true] %s142_s7 }
  0x1a   : > { %s377_s17 = sshll.u32 %s138_s8, 6  ;;  %p704_p0 = pnand %p402_p13, %p671_p3 }
  0x1b   : > { %s711_s21 = scalar_lea.hbm %s816_s0, %s377_s17  ;;  %s129_s27 = scalar_lea.sflag [#allocation3], %s128_s29 }
  0x1c   : > { %s470_s3 = scalar_lea.hbm %s711_s21, 128  ;;  %p472_p3 = pneg %p704_p0 }
  0x1d   : > { %p471_p4 = scmp.ne.s32.totalorder %s711_s21, %s470_s3  ;;  %s475_s5 = scalar_lea.hbm %s816_s0, 512 }
  0x1e   : > { %p476_p7 = scmp.lt.u32.totalorder %s711_s21, %s816_s0  ;;  %p477_p10 = scmp.lt.u32.totalorder %s475_s5, %s470_s3 }
  0x1f   : > { %p473_p5 = pnand %p472_p3, %p471_p4  ;;  %p479_p13 = scmp.lt.u32.totalorder %s470_s3, %s711_s21 }
  0x20   : > { %p478_p11 = por %p477_p10, %p476_p7 }
  0x21   : > { %p474_p6 = pneg %p473_p5 }
  0x22   : > { %p480_p1 = por %p479_p13, %p478_p11 }
  0x24   : > { %p481_p2 = pnand %p480_p1, %p474_p6 }
  0x26   : > { %484 = shalt.err (!%p481_p2)
}
  0x27   : > { %s485_s29 = scalar_lea.vmem %s700_s7, 128  ;;  %s600_s17 = smov [#allocation2]  }
  0x28   : > { %p486_p4 = scmp.ne.s32.totalorder %s700_s7, %s485_s29  ;;  %s490_s22 = sshll.u32 %s600_s17, 4  ;;  %s491_s22 = int_to_ptr.vmem [resolvable:$false] %s490_s22 }
  0x29   : > { %s492_s26 = scalar_lea.vmem %s491_s22, 256  ;;  %p493_p9 = scmp.lt.s32.totalorder %s700_s7, %s491_s22 }
  0x2a   : > { %p488_p5 = pnand %p486_p4, %p472_p3  ;;  %p494_p7 = scmp.lt.s32.totalorder %s492_s26, %s485_s29 }
  0x2c   : > { %p489_p12 = pneg %p488_p5  ;;  %p495_p10 = por %p494_p7, %p493_p9 }
  0x2e   : > { %p496_p11 = pnand %p495_p10, %p489_p12 }
  0x30   : > { %499 = shalt.err (!%p496_p11)
}
  0x31   : > { %397 = dma.hbm_to_vmem [thread:$0]  (!%p704_p0), %s711_s21, 128, %s700_s7, %s129_s27  }
  0x32   : > { %p825_p1 = scmp.lt.s32.totalorder %s598_s16, 5  ;;  %p826_p2 = scmp.ge.s32.totalorder %s598_s16, 1 }
  0x34   : > { %p148_p3 = pnand %p826_p2, %p825_p1 }
  0x35   : > { %s745_s3 = sand.u32 (!%p148_p3), 1, %s574_s10  }
  0x36   : > { %151 = sbr.rel (%p148_p3) target bundleno = 294 (0x126), region = 28  ;;  %s379_s23 = sshll.u32 (!%p148_p3), %s745_s3, 3 }
  0x37   : > { %s154_s4 = scalar_lea.sflag (!%p148_p3), [#allocation3], %s745_s3  ;;  %s157_s5 = scalar_lea.vmem (!%p148_p3), [#allocation2], %s379_s23 }
  0x3d   : > { %561 = dma.done.wait (%p679_p8), %s154_s4, 128  }
  0x3e   : > { %563 = vsyncadd (%p679_p8), %s154_s4, 4294967168  ;;  %v601_v0 = vmov 0.0   ;;  %v181_v1 = vld [vmem:[%s157_s5] sm:$0xff]  ;;  %vm188_vm0 = vcmask 1043456   ;;  %vm184_vm1 = vcmask 31744   ;;  %s380_s21 = sshll.u32 %s745_s3, 4 }
  0x3f   : > { %257 = vmatprep.mubr.f32.mxu0 %v601_v0  ;;  %v183_v2 = vcombine.high %v181_v1, %v181_v1  ;;  %v180_v3 = vld [vmem:[%s817_s1] sm:$0xff]  ;;  %s385_s24 = sshll.u32 %s582_s12, 1  ;;  %s386_s27 = sshll.u32 %s586_s13, 2 }
  0x40   : > { %s279_s6 = sadd.s32 %s386_s27, %s385_s24  ;;  %s177_s8 = scalar_lea.vmem [#allocation5], %s380_s21 }
  0x41   : > { %381 = vmatprep.subr.msk.mxu0 %vm188_vm0, %v183_v2  ;;  %s283_s29 = sshll.u32 %s177_s8, 4  ;;  %s387_s17 = sshll.u32 %s279_s6, 7  ;;  %s759_s29 = int_to_ptr.vmem [resolvable:$true] %s283_s29 }
  0x42   : > { %382 = vmatpush1.msk.msra.mxu0 %vm188_vm0, %v181_v1  ;;  %s764_s23 = scalar_lea.hbm %s818_s2, %s387_s17  ;;  %s267_s12 = scalar_lea.sflag [#allocation4], %s745_s3 }
  0x43   : > { %383 = vmatmul.mubr.msk.f32.vlgmr.msra.gmra.mrb[0].mxu0 %vm184_vm1, %v180_v3  ;;  %s500_s13 = scalar_lea.vmem %s759_s29, 256  ;;  %p827_p9 = scmp.ne.s32.totalorder %s822_s25, 0 }
  0x44   : > { %p501_p8 = scmp.ne.s32.totalorder %s759_s29, %s500_s13  ;;  %s602_s4 = smov [#allocation5]  }
  0x45   : > { %s504_s5 = sshll.u32 %s602_s4, 4  ;;  %s505_s5 = int_to_ptr.vmem [resolvable:$false] %s504_s5 }
  0x46   : > { %p502_p12 = pnand %p501_p8, %p827_p9  ;;  %s506_s7 = scalar_lea.vmem %s505_s5, 512 }
  0x47   : > { %p507_p6 = scmp.lt.s32.totalorder %s759_s29, %s505_s5  ;;  %p508_p13 = scmp.lt.s32.totalorder %s506_s7, %s500_s13 }
  0x48   : > { %p503_p0 = pneg %p502_p12 }
  0x49   : > { %p509_p4 = por %p508_p13, %p507_p6 }
  0x4b   : > { %p510_p5 = pnand %p509_p4, %p503_p0 }
 0x116   : > { %v259_v4 = vpop.f32.mrb[0].mxu0 }
 0x117   : > { %264 = vst [vmem:[%s177_s8] sm:$0xff] %v259_v4  ;;  %v261_v5 = vpop.f32.mrb[1].mxu0 }
 0x118   : > { %265 = vst [vmem:[%s177_s8 + $0x8] sm:$0xff] %v261_v5 }
 0x119   : > { %513 = shalt.err (!%p510_p5)
}
 0x11a   : > { %s514_s3 = scalar_lea.hbm %s764_s23, 256  ;;  %s518_s24 = scalar_lea.hbm %s818_s2, 1024 }
 0x11b   : > { %p515_p7 = scmp.ne.s32.totalorder %s764_s23, %s514_s3  ;;  %p519_p1 = scmp.lt.u32.totalorder %s764_s23, %s818_s2 }
 0x11c   : > { %p520_p2 = scmp.lt.u32.totalorder %s518_s24, %s514_s3  ;;  %p522_p8 = scmp.lt.u32.totalorder %s514_s3, %s764_s23 }
 0x11d   : > { %p516_p10 = pnand %p515_p7, %p827_p9 }
 0x11e   : > { %p521_p3 = por %p520_p2, %p519_p1 }
 0x11f   : > { %p517_p11 = pneg %p516_p10 }
 0x120   : > { %p523_p12 = por %p522_p8, %p521_p3 }
 0x122   : > { %p524_p0 = pnand %p523_p12, %p517_p11 }
 0x124   : > { %527 = shalt.err (!%p524_p0)
}
 0x125   : > { %392 = dma.vmem_to_hbm [thread:$0]  (%p827_p9), %s759_s29, 256, %s764_s23, %s267_s12  }
 0x126 PF: > { %p403_p6 = scmp.ge.s32.totalorder %s598_s16, 2  ;;  %s295_s8 = sand.u32 1, %s570_s9  }
 0x127   : > { %p828_p13 = scmp.ne.s32.totalorder %s823_s28, 0  ;;  %s296_s17 = scalar_lea.sflag [#allocation4], %s295_s8 }
 0x129   : > { %p399_p4 = pnand %p403_p6, %p828_p13 }
 0x12b   : > { %565 = dma.done.wait (!%p399_p4), %s296_s17, 256  }
 0x12c   : > { %567 = vsyncadd (!%p399_p4), %s296_s17, 4294967040  ;;  %s18_s16 = sadd.s32 1, %s598_s16   ;;  %s829_s9 = smov %s574_s10 }
 0x12d   : > { %p15_p5 = scmp.ge.s32.totalorder %s18_s16, 6   ;;  %s830_s10 = smov %s578_s11 }
 0x12e   : > { %s831_s11 = smov %s696_s30  ;;  %s832_s12 = smov %s590_s14 }
 0x12f   : > { %s833_s13 = smov %s594_s15  ;;  %s834_s14 = smov %s837_s19 }
 0x130   : > { %s835_s15 = smov %s841_s20  ;;  %17 = sbr.rel (!%p15_p5) target bundleno = 7 (0x7), region = 73 }
 0x137   :  { %301 = vsyncpa [#allocation3], 1 }
 0x138   :  { %303 = vsyncpa [#allocation3 + $0x1], 1 }
 0x139   :  { %304 = vsyncpa [#allocation4], 1 }
 0x13a   :  { %306 = vsyncpa [#allocation4 + $0x1], 1 }

</bundles_post_ra>
